<compile_context>
chip_gen: v5e
topology: v5e:2x2
jax: 0.10.0
libtpu: 0.0.40
codegen_flags: <defaults>
</compile_context>

<pallas_src>
import math

import numpy as np
import jax
import jax.numpy as jnp
from jax.experimental import pallas as pl
from jax.experimental.pallas import tpu as pltpu

# ---------------- configuration (small, consistent with the module) ----------
T = 2          # number of tasks (context.size(0))
N = 8          # context transitions per task
B = 4          # observations per task in forward()
OBS_DIM = 16
ACT_DIM = 4
LATENT = 8     # latent_dim
CTX_DIM = OBS_DIM + ACT_DIM + 1   # [o, a, r]  (use_next_obs_in_context=False)
HID = 32
ENC_OUT = 2 * LATENT              # use_ib=True -> mu || pre-softplus sigma^2

LOG_SIG_MIN, LOG_SIG_MAX = -20.0, 2.0
LOG_2PI = math.log(2.0 * math.pi)

# ---------------- lane-dense packed parameter slab: (56, 128) f32 ------------
# name -> (row0, n_rows, lane0, n_cols); rows 8-aligned, lanes 32-aligned (8 for heads).
SLAB_ROWS, SLAB_LANES = 56, 128
_SLAB = {
    "e1w":     (0,  CTX_DIM,  0,   HID),          # encoder layer 1 weight (21, 32)
    "e1b":     (24, 1,        0,   HID),
    "p1w_obs": (32, OBS_DIM,  0,   HID),          # policy layer-1 weight, obs half
    "p1w_z":   (48, LATENT,   0,   HID),          # policy layer-1 weight, task_z half
    "e2w":     (0,  HID,      32,  HID),
    "e2b":     (32, 1,        32,  HID),
    "p1b":     (40, 1,        32,  HID),
    "p2b":     (48, 1,        32,  HID),
    "p2w":     (0,  HID,      64,  HID),
    "seg":     (32, T,        64,  T * N),        # per-task segment-sum selector (2, 16)
    "rep":     (40, T * B,    64,  T),            # repeat(z, B) selector (8, 2)
    "e3w":     (0,  HID,      96,  ENC_OUT),
    "e3b":     (32, 1,        96,  ENC_OUT),
    "phw":     (0,  HID,      112, 2 * ACT_DIM),  # fused mean||log_std head weight
    "phb":     (32, 1,        112, 2 * ACT_DIM),
}

# ---------------- packed per-call activation slab: (40, 128) f32 -------------
ACT_ROWS, ACT_LANES = 40, 128
_ACT = {
    "ctx":   (0,  T * N, 0, CTX_DIM),
    "obs":   (16, T * B, 0, OBS_DIM),
    "eps_a": (24, T * B, 0, ACT_DIM),
    "eps_z": (32, T,     0, LATENT),
}

# ---------------- single lane-dense output slab: (16, 128) f32 ---------------
OUT_ROWS, OUT_LANES = 16, 128
_A0, _M0, _S0, _LP0, _Z0 = 0, ACT_DIM, 2 * ACT_DIM, 3 * ACT_DIM, 3 * ACT_DIM + 1
POL_LANES = 3 * ACT_DIM + 1 + LATENT   # action | mean | log_std | log_prob | task_z = 21
ZST_LANES = 3 * LATENT                 # z | z_means | z_vars = 24


# ---------------- the fused kernel --------------------------------------------
def _agent_fwd_kernel(act_ref, slab_ref, out_ref):
    f32 = jnp.float32

    def W(name):
        r0, nr, c0, nc = _SLAB[name]
        return slab_ref[r0:r0 + nr, c0:c0 + nc]

    def A(name):
        r0, nr, c0, nc = _ACT[name]
        return act_ref[r0:r0 + nr, c0:c0 + nc]

    def dot(a, b):
        return jnp.dot(a, b, preferred_element_type=f32)

    # ---- context encoder MLP: (T*N, CTX_DIM) -> (T*N, 2*LATENT) ----
    h = jnp.maximum(dot(A("ctx"), W("e1w")) + W("e1b"), 0.0)
    h = jnp.maximum(dot(h, W("e2w")) + W("e2b"), 0.0)
    enc = dot(h, W("e3w")) + W("e3b")                         # (T*N, 2L)

    # ---- product-of-Gaussians posterior, vectorized over tasks ----
    mu = enc[:, :LATENT]                                      # (T*N, L)
    sig_sq = jnp.maximum(jax.nn.softplus(enc[:, LATENT:]), 1e-7)   # clamp(min=1e-7)
    inv = 1.0 / sig_sq                                        # exact 1/sigma^2
    seg = W("seg")                                            # static (T, T*N) selector
    sum_inv = dot(seg, inv)                                   # (T, L) per-task sums (MXU)
    sum_mu = dot(seg, mu * inv)                               # (T, L)
    var = 1.0 / sum_inv                                       # exact outer reciprocal
    mean = var * sum_mu
    z = mean + jnp.sqrt(var) * A("eps_z")                     # Normal rsample, (T, L)

    # ---- task_z = repeat(z, B) via static selector matmul ----
    task_z = dot(W("rep"), z)                                 # (T*B, L)
    # (.detach() is a no-op in this forward-only kernel)

    # ---- Tanh-Gaussian policy MLP (layer 1 split: no lane concat) ----
    h = jnp.maximum(dot(A("obs"), W("p1w_obs")) + dot(task_z, W("p1w_z")) + W("p1b"), 0.0)
    h = jnp.maximum(dot(h, W("p2w")) + W("p2b"), 0.0)
    heads = dot(h, W("phw")) + W("phb")                       # (T*B, 2*ACT) fused head
    mean_a = heads[:, :ACT_DIM]
    log_std = jnp.clip(heads[:, ACT_DIM:], LOG_SIG_MIN, LOG_SIG_MAX)
    std = jnp.exp(log_std)

    eps = A("eps_a")
    pre_tanh = mean_a + std * eps                             # rsample
    action = jnp.tanh(pre_tanh)
    # Normal log-prob at pre_tanh ((pre-mean)/std == eps) + tanh correction
    lp = (-0.5 * eps * eps - log_std - 0.5 * LOG_2PI
          - jnp.log(1.0 - action * action + 1e-6))
    log_prob = jnp.sum(lp, axis=1, keepdims=True)             # (T*B, 1)

    # ---- single lane-dense output slab, one full-width store ----
    pol_block = jnp.concatenate(
        [action, mean_a, log_std, log_prob, task_z,
         jnp.zeros((T * B, OUT_LANES - POL_LANES), f32)], axis=1)        # (T*B, 128)
    z_block = jnp.concatenate(
        [z, mean, var, jnp.zeros((T, OUT_LANES - ZST_LANES), f32)], axis=1)  # (T, 128)
    pad_block = jnp.zeros((OUT_ROWS - T * B - T, OUT_LANES), f32)
    out_ref[...] = jnp.concatenate([pol_block, z_block, pad_block], axis=0)


_COST = pl.CostEstimate(flops=130_000, transcendentals=600, bytes_accessed=60_000)


def _agent_fwd_call(act_slab, param_slab):
    vmem = pl.BlockSpec(memory_space=pltpu.MemorySpace.VMEM)
    return pl.pallas_call(
        _agent_fwd_kernel,
        out_shape=jax.ShapeDtypeStruct((OUT_ROWS, OUT_LANES), jnp.float32),
        in_specs=[vmem, vmem],
        out_specs=vmem,
        cost_estimate=_COST,
    )(act_slab, param_slab)


# ---------------- Agent.forward (use_ib=True) ---------------------------------
@jax.jit
def agent_forward(obs, context, param_slab, eps_z, eps_a):
    """obs: (T, B, OBS_DIM); context: (T, N, CTX_DIM).
    Returns ((action, mean, log_std, log_prob), task_z, (z, z_means, z_vars)).
    First two match Agent.forward's use_ib=True return; the last tuple is the module's
    updated z / z_means / z_vars buffers (side effect of infer_posterior/sample_z)."""
    act = jnp.zeros((ACT_ROWS, ACT_LANES), jnp.float32)
    pieces = {
        "ctx": context.reshape(T * N, CTX_DIM),
        "obs": obs.reshape(T * B, OBS_DIM),
        "eps_a": eps_a,
        "eps_z": eps_z,
    }
    for name, val in pieces.items():
        r0, nr, c0, nc = _ACT[name]
        act = act.at[r0:r0 + nr, c0:c0 + nc].set(val)

    out = _agent_fwd_call(act, param_slab)

    pol = out[:T * B]
    action = pol[:, _A0:_M0]
    mean = pol[:, _M0:_S0]
    log_std = pol[:, _S0:_LP0]
    log_prob = pol[:, _LP0:_Z0]
    task_z = pol[:, _Z0:_Z0 + LATENT]
    zs = out[T * B:T * B + T]
    z = zs[:, :LATENT]
    z_means = zs[:, LATENT:2 * LATENT]
    z_vars = zs[:, 2 * LATENT:3 * LATENT]

    policy_outputs = (action, mean, log_std, log_prob)
    # TODO(synk): non-IB branch (mean/std posterior + task_z_vars repeat) not exercised here.
    # TODO(synk): stateful pieces (update_context*, target_policy, clear_z buffers) are
    #             host-side bookkeeping with no kernel equivalent.
    return policy_outputs, task_z, (z, z_means, z_vars)


# ---------------- parameter construction (deterministic, synthetic) ----------
def _linear(key, fan_in, fan_out):
    kw, kb = jax.random.split(key)
    bound = 1.0 / math.sqrt(fan_in)
    w = jax.random.uniform(kw, (fan_in, fan_out), jnp.float32, -bound, bound)
    b = jax.random.uniform(kb, (1, fan_out), jnp.float32, -bound, bound)
    return w, b


def make_params(key):
    keys = jax.random.split(key, 6)
    # context encoder MLP: CTX_DIM -> HID -> HID -> 2*LATENT
    e1w, e1b = _linear(keys[0], CTX_DIM, HID)
    e2w, e2b = _linear(keys[1], HID, HID)
    e3w, e3b = _linear(keys[2], HID, ENC_OUT)
    enc = (e1w, e1b, e2w, e2b, e3w, e3b)
    # policy MLP: (OBS+LATENT) -> HID -> HID -> {mean, log_std} heads
    p1w, p1b = _linear(keys[3], OBS_DIM + LATENT, HID)
    p2w, p2b = _linear(keys[4], HID, HID)
    km, ks = jax.random.split(keys[5])
    pmw, pmb = _linear(km, HID, ACT_DIM)
    psw, psb = _linear(ks, HID, ACT_DIM)
    pol = (p1w, p1b, p2w, p2b, pmw, pmb, psw, psb)
    return enc, pol


def pack_params(enc, pol):
    """Pack all weights/biases + static selector matrices into one (56, 128) f32 slab."""
    e1w, e1b, e2w, e2b, e3w, e3b = enc
    p1w, p1b, p2w, p2b, pmw, pmb, psw, psb = pol
    # static selector matrices (baked constants, T/N/B are Python constants)
    seg = (np.arange(T * N)[None, :] // N == np.arange(T)[:, None]).astype(np.float32)
    rep = (np.arange(T * B)[:, None] // B == np.arange(T)[None, :]).astype(np.float32)
    tensors = dict(
        e1w=e1w, e1b=e1b, e2w=e2w, e2b=e2b, e3w=e3w, e3b=e3b,
        p1w_obs=p1w[:OBS_DIM], p1w_z=p1w[OBS_DIM:], p1b=p1b,
        p2w=p2w, p2b=p2b,
        phw=jnp.concatenate([pmw, psw], axis=1),
        phb=jnp.concatenate([pmb, psb], axis=1),
        seg=jnp.asarray(seg), rep=jnp.asarray(rep),
    )
    slab = jnp.zeros((SLAB_ROWS, SLAB_LANES), jnp.float32)
    for name, (r0, nr, c0, nc) in _SLAB.items():
        slab = slab.at[r0:r0 + nr, c0:c0 + nc].set(tensors[name])
    return slab


# ---------------- pure-JAX reference (for correctness check) ------------------
def reference_forward(obs, context, enc, pol, eps_z, eps_a):
    e1w, e1b, e2w, e2b, e3w, e3b = enc
    p1w, p1b, p2w, p2b, pmw, pmb, psw, psb = pol
    ctx = context.reshape(T * N, CTX_DIM)
    h = jax.nn.relu(ctx @ e1w + e1b)
    h = jax.nn.relu(h @ e2w + e2b)
    params = (h @ e3w + e3b).reshape(T, N, ENC_OUT)
    mu = params[..., :LATENT]
    sig_sq = jnp.maximum(jax.nn.softplus(params[..., LATENT:]), 1e-7)
    var = 1.0 / jnp.sum(1.0 / sig_sq, axis=1)
    mean = var * jnp.sum(mu / sig_sq, axis=1)
    z = mean + jnp.sqrt(var) * eps_z
    task_z = jnp.repeat(z, B, axis=0)
    x = jnp.concatenate([obs.reshape(T * B, OBS_DIM), task_z], axis=1)
    h = jax.nn.relu(x @ p1w + p1b)
    h = jax.nn.relu(h @ p2w + p2b)
    m = h @ pmw + pmb
    log_std = jnp.clip(h @ psw + psb, LOG_SIG_MIN, LOG_SIG_MAX)
    a = jnp.tanh(m + jnp.exp(log_std) * eps_a)
    lp = jnp.sum(-0.5 * eps_a * eps_a - log_std - 0.5 * LOG_2PI
                 - jnp.log(1.0 - a * a + 1e-6), axis=1, keepdims=True)
    return (a, m, log_std, lp), task_z, (z, mean, var)


if __name__ == "__main__":
    key = jax.random.PRNGKey(0)
    k_obs, k_ctx, k_ez, k_ea = jax.random.split(key, 4)

    obs = jax.random.normal(k_obs, (T, B, OBS_DIM), jnp.float32)
    context = jax.random.normal(k_ctx, (T, N, CTX_DIM), jnp.float32)
    eps_z = jax.random.normal(k_ez, (T, LATENT), jnp.float32)       # rsample noise for z
    eps_a = jax.random.normal(k_ea, (T * B, ACT_DIM), jnp.float32)  # rsample noise for action

    enc_params, pol_params = make_params(jax.random.PRNGKey(42))
    param_slab = pack_params(enc_params, pol_params)

    (action, mean, log_std, log_prob), task_z, (z, z_means, z_vars) = agent_forward(
        obs, context, param_slab, eps_z, eps_a)
    jax.block_until_ready((action, mean, log_std, log_prob, task_z, z, z_means, z_vars))

    # shape checks
    assert action.shape == (T * B, ACT_DIM)
    assert mean.shape == (T * B, ACT_DIM)
    assert log_std.shape == (T * B, ACT_DIM)
    assert log_prob.shape == (T * B, 1)
    assert task_z.shape == (T * B, LATENT)
    assert z_means.shape == (T, LATENT) and z_vars.shape == (T, LATENT)
    assert bool(jnp.all(jnp.isfinite(action))) and bool(jnp.all(jnp.isfinite(log_prob)))
    assert bool(jnp.all(z_vars > 0.0))

    # numeric check vs. pure-JAX reference (exact reciprocals -> tighter tolerances)
    (ra, rm, rls, rlp), rtz, (rz, rzm, rzv) = reference_forward(
        obs, context, enc_params, pol_params, eps_z, eps_a)
    assert bool(jnp.allclose(task_z, rtz, atol=2e-2, rtol=2e-2))
    assert bool(jnp.allclose(z_means, rzm, atol=2e-2, rtol=2e-2))
    assert bool(jnp.allclose(z_vars, rzv, atol=2e-2, rtol=2e-2))
    assert bool(jnp.allclose(z, rz, atol=2e-2, rtol=2e-2))
    assert bool(jnp.allclose(action, ra, atol=2e-2, rtol=2e-2))
    assert bool(jnp.allclose(mean, rm, atol=2e-2, rtol=2e-2))
    assert bool(jnp.allclose(log_std, rls, atol=2e-2, rtol=2e-2))
    assert bool(jnp.allclose(log_prob, rlp, atol=2e-1, rtol=5e-2))

    print("KERNEL_OK")
</pallas_src>

<mosaic_0001>
module attributes {stable_mosaic.version = 11 : i64} {
  func.func @_agent_fwd_kernel(%arg0: memref<40x128xf32, #tpu.memory_space<vmem>>, %arg1: memref<56x128xf32, #tpu.memory_space<vmem>>, %arg2: memref<16x128xf32, #tpu.memory_space<vmem>>) attributes {dimension_semantics = [], scalar_prefetch = 0 : i64, scratch_operands = 0 : i64, tpu.core_type = #tpu.core_type<tc>} {
    %c0 = arith.constant 0 : index
    %c0_0 = arith.constant 0 : index
    %0 = vector.load %arg0[%c0, %c0_0] : memref<40x128xf32, #tpu.memory_space<vmem>>, vector<16x21xf32>
    %c0_1 = arith.constant 0 : index
    %c0_2 = arith.constant 0 : index
    %1 = vector.load %arg1[%c0_1, %c0_2] : memref<56x128xf32, #tpu.memory_space<vmem>>, vector<21x32xf32>
    %cst = arith.constant dense<0.000000e+00> : vector<16x32xf32>
    %2 = tpu.matmul %0, %1, %cst {dimension_numbers = #tpu.dot_dimension_numbers<[1], [0], [0], [1], [0, 0, 1, 1], [], []>} : vector<16x21xf32>, vector<21x32xf32>, vector<16x32xf32> -> vector<16x32xf32>
    %c24 = arith.constant 24 : index
    %c0_3 = arith.constant 0 : index
    %3 = vector.load %arg1[%c24, %c0_3] : memref<56x128xf32, #tpu.memory_space<vmem>>, vector<1x32xf32>
    %4 = vector.broadcast %3 : vector<1x32xf32> to vector<16x32xf32>
    %5 = arith.addf %2, %4 : vector<16x32xf32>
    %cst_4 = arith.constant 0.000000e+00 : f32
    %6 = vector.broadcast %cst_4 : f32 to vector<16x32xf32>
    %7 = arith.maximumf %5, %6 : vector<16x32xf32>
    %c0_5 = arith.constant 0 : index
    %c32 = arith.constant 32 : index
    %8 = vector.load %arg1[%c0_5, %c32] : memref<56x128xf32, #tpu.memory_space<vmem>>, vector<32x32xf32>
    %cst_6 = arith.constant dense<0.000000e+00> : vector<16x32xf32>
    %9 = tpu.matmul %7, %8, %cst_6 {dimension_numbers = #tpu.dot_dimension_numbers<[1], [0], [0], [1], [0, 0, 1, 1], [], []>} : vector<16x32xf32>, vector<32x32xf32>, vector<16x32xf32> -> vector<16x32xf32>
    %c32_7 = arith.constant 32 : index
    %c32_8 = arith.constant 32 : index
    %10 = vector.load %arg1[%c32_7, %c32_8] : memref<56x128xf32, #tpu.memory_space<vmem>>, vector<1x32xf32>
    %11 = vector.broadcast %10 : vector<1x32xf32> to vector<16x32xf32>
    %12 = arith.addf %9, %11 : vector<16x32xf32>
    %cst_9 = arith.constant 0.000000e+00 : f32
    %13 = vector.broadcast %cst_9 : f32 to vector<16x32xf32>
    %14 = arith.maximumf %12, %13 : vector<16x32xf32>
    %c0_10 = arith.constant 0 : index
    %c96 = arith.constant 96 : index
    %15 = vector.load %arg1[%c0_10, %c96] : memref<56x128xf32, #tpu.memory_space<vmem>>, vector<32x16xf32>
    %cst_11 = arith.constant dense<0.000000e+00> : vector<16x16xf32>
    %16 = tpu.matmul %14, %15, %cst_11 {dimension_numbers = #tpu.dot_dimension_numbers<[1], [0], [0], [1], [0, 0, 1, 1], [], []>} : vector<16x32xf32>, vector<32x16xf32>, vector<16x16xf32> -> vector<16x16xf32>
    %c32_12 = arith.constant 32 : index
    %c96_13 = arith.constant 96 : index
    %17 = vector.load %arg1[%c32_12, %c96_13] : memref<56x128xf32, #tpu.memory_space<vmem>>, vector<1x16xf32>
    %18 = vector.broadcast %17 : vector<1x16xf32> to vector<16x16xf32>
    %19 = arith.addf %16, %18 : vector<16x16xf32>
    %20 = vector.extract_strided_slice %19 {offsets = [0, 0], sizes = [16, 8], strides = [1, 1]} : vector<16x16xf32> to vector<16x8xf32>
    %21 = vector.extract_strided_slice %19 {offsets = [0, 8], sizes = [16, 8], strides = [1, 1]} : vector<16x16xf32> to vector<16x8xf32>
    %cst_14 = arith.constant 0.000000e+00 : f32
    %22 = vector.broadcast %cst_14 : f32 to vector<16x8xf32>
    %23 = arith.maximumf %21, %22 : vector<16x8xf32>
    %24 = vector.broadcast %cst_14 : f32 to vector<16x8xf32>
    %25 = arith.subf %21, %24 : vector<16x8xf32>
    %26 = arith.cmpf one, %25, %25 : vector<16x8xf32>
    %27 = vector.broadcast %cst_14 : f32 to vector<16x8xf32>
    %28 = arith.addf %21, %27 : vector<16x8xf32>
    %29 = math.absf %25 : vector<16x8xf32>
    %cst_15 = arith.constant 0.000000e+00 : f32
    %30 = vector.broadcast %cst_15 : f32 to vector<16x8xf32>
    %31 = arith.subf %30, %29 : vector<16x8xf32>
    %32 = math.exp %31 : vector<16x8xf32>
    %33 = math.log1p %32 : vector<16x8xf32>
    %34 = arith.addf %23, %33 : vector<16x8xf32>
    %35 = arith.select %26, %28, %34 : vector<16x8xi1>, vector<16x8xf32>
    %cst_16 = arith.constant 1.000000e-07 : f32
    %36 = vector.broadcast %cst_16 : f32 to vector<16x8xf32>
    %37 = arith.maximumf %35, %36 : vector<16x8xf32>
    %cst_17 = arith.constant 1.000000e+00 : f32
    %38 = vector.broadcast %cst_17 : f32 to vector<16x8xf32>
    %39 = arith.divf %38, %37 : vector<16x8xf32>
    %c32_18 = arith.constant 32 : index
    %c64 = arith.constant 64 : index
    %40 = vector.load %arg1[%c32_18, %c64] : memref<56x128xf32, #tpu.memory_space<vmem>>, vector<2x16xf32>
    %cst_19 = arith.constant dense<0.000000e+00> : vector<2x8xf32>
    %41 = tpu.matmul %40, %39, %cst_19 {dimension_numbers = #tpu.dot_dimension_numbers<[1], [0], [0], [1], [0, 0, 1, 1], [], []>} : vector<2x16xf32>, vector<16x8xf32>, vector<2x8xf32> -> vector<2x8xf32>
    %42 = arith.mulf %20, %39 : vector<16x8xf32>
    %cst_20 = arith.constant dense<0.000000e+00> : vector<2x8xf32>
    %43 = tpu.matmul %40, %42, %cst_20 {dimension_numbers = #tpu.dot_dimension_numbers<[1], [0], [0], [1], [0, 0, 1, 1], [], []>} : vector<2x16xf32>, vector<16x8xf32>, vector<2x8xf32> -> vector<2x8xf32>
    %cst_21 = arith.constant 1.000000e+00 : f32
    %44 = vector.broadcast %cst_21 : f32 to vector<2x8xf32>
    %45 = arith.divf %44, %41 : vector<2x8xf32>
    %46 = arith.mulf %45, %43 : vector<2x8xf32>
    %47 = math.sqrt %45 : vector<2x8xf32>
    %c32_22 = arith.constant 32 : index
    %c0_23 = arith.constant 0 : index
    %48 = vector.load %arg0[%c32_22, %c0_23] : memref<40x128xf32, #tpu.memory_space<vmem>>, vector<2x8xf32>
    %49 = arith.mulf %47, %48 : vector<2x8xf32>
    %50 = arith.addf %46, %49 : vector<2x8xf32>
    %c40 = arith.constant 40 : index
    %c64_24 = arith.constant 64 : index
    %51 = vector.load %arg1[%c40, %c64_24] : memref<56x128xf32, #tpu.memory_space<vmem>>, vector<8x2xf32>
    %cst_25 = arith.constant dense<0.000000e+00> : vector<8x8xf32>
    %52 = tpu.matmul %51, %50, %cst_25 {dimension_numbers = #tpu.dot_dimension_numbers<[1], [0], [0], [1], [0, 0, 1, 1], [], []>} : vector<8x2xf32>, vector<2x8xf32>, vector<8x8xf32> -> vector<8x8xf32>
    %c16 = arith.constant 16 : index
    %c0_26 = arith.constant 0 : index
    %53 = vector.load %arg0[%c16, %c0_26] : memref<40x128xf32, #tpu.memory_space<vmem>>, vector<8x16xf32>
    %c32_27 = arith.constant 32 : index
    %c0_28 = arith.constant 0 : index
    %54 = vector.load %arg1[%c32_27, %c0_28] : memref<56x128xf32, #tpu.memory_space<vmem>>, vector<16x32xf32>
    %cst_29 = arith.constant dense<0.000000e+00> : vector<8x32xf32>
    %55 = tpu.matmul %53, %54, %cst_29 {dimension_numbers = #tpu.dot_dimension_numbers<[1], [0], [0], [1], [0, 0, 1, 1], [], []>} : vector<8x16xf32>, vector<16x32xf32>, vector<8x32xf32> -> vector<8x32xf32>
    %c48 = arith.constant 48 : index
    %c0_30 = arith.constant 0 : index
    %56 = vector.load %arg1[%c48, %c0_30] : memref<56x128xf32, #tpu.memory_space<vmem>>, vector<8x32xf32>
    %cst_31 = arith.constant dense<0.000000e+00> : vector<8x32xf32>
    %57 = tpu.matmul %52, %56, %cst_31 {dimension_numbers = #tpu.dot_dimension_numbers<[1], [0], [0], [1], [0, 0, 1, 1], [], []>} : vector<8x8xf32>, vector<8x32xf32>, vector<8x32xf32> -> vector<8x32xf32>
    %58 = arith.addf %55, %57 : vector<8x32xf32>
    %c40_32 = arith.constant 40 : index
    %c32_33 = arith.constant 32 : index
    %59 = vector.load %arg1[%c40_32, %c32_33] : memref<56x128xf32, #tpu.memory_space<vmem>>, vector<1x32xf32>
    %60 = vector.broadcast %59 : vector<1x32xf32> to vector<8x32xf32>
    %61 = arith.addf %58, %60 : vector<8x32xf32>
    %cst_34 = arith.constant 0.000000e+00 : f32
    %62 = vector.broadcast %cst_34 : f32 to vector<8x32xf32>
    %63 = arith.maximumf %61, %62 : vector<8x32xf32>
    %c0_35 = arith.constant 0 : index
    %c64_36 = arith.constant 64 : index
    %64 = vector.load %arg1[%c0_35, %c64_36] : memref<56x128xf32, #tpu.memory_space<vmem>>, vector<32x32xf32>
    %cst_37 = arith.constant dense<0.000000e+00> : vector<8x32xf32>
    %65 = tpu.matmul %63, %64, %cst_37 {dimension_numbers = #tpu.dot_dimension_numbers<[1], [0], [0], [1], [0, 0, 1, 1], [], []>} : vector<8x32xf32>, vector<32x32xf32>, vector<8x32xf32> -> vector<8x32xf32>
    %c48_38 = arith.constant 48 : index
    %c32_39 = arith.constant 32 : index
    %66 = vector.load %arg1[%c48_38, %c32_39] : memref<56x128xf32, #tpu.memory_space<vmem>>, vector<1x32xf32>
    %67 = vector.broadcast %66 : vector<1x32xf32> to vector<8x32xf32>
    %68 = arith.addf %65, %67 : vector<8x32xf32>
    %cst_40 = arith.constant 0.000000e+00 : f32
    %69 = vector.broadcast %cst_40 : f32 to vector<8x32xf32>
    %70 = arith.maximumf %68, %69 : vector<8x32xf32>
    %c0_41 = arith.constant 0 : index
    %c112 = arith.constant 112 : index
    %71 = vector.load %arg1[%c0_41, %c112] : memref<56x128xf32, #tpu.memory_space<vmem>>, vector<32x8xf32>
    %cst_42 = arith.constant dense<0.000000e+00> : vector<8x8xf32>
    %72 = tpu.matmul %70, %71, %cst_42 {dimension_numbers = #tpu.dot_dimension_numbers<[1], [0], [0], [1], [0, 0, 1, 1], [], []>} : vector<8x32xf32>, vector<32x8xf32>, vector<8x8xf32> -> vector<8x8xf32>
    %c32_43 = arith.constant 32 : index
    %c112_44 = arith.constant 112 : index
    %73 = vector.load %arg1[%c32_43, %c112_44] : memref<56x128xf32, #tpu.memory_space<vmem>>, vector<1x8xf32>
    %74 = vector.broadcast %73 : vector<1x8xf32> to vector<8x8xf32>
    %75 = arith.addf %72, %74 : vector<8x8xf32>
    %76 = vector.extract_strided_slice %75 {offsets = [0, 0], sizes = [8, 4], strides = [1, 1]} : vector<8x8xf32> to vector<8x4xf32>
    %77 = vector.extract_strided_slice %75 {offsets = [0, 4], sizes = [8, 4], strides = [1, 1]} : vector<8x8xf32> to vector<8x4xf32>
    %cst_45 = arith.constant -2.000000e+01 : f32
    %cst_46 = arith.constant 2.000000e+00 : f32
    %78 = vector.broadcast %cst_45 : f32 to vector<8x4xf32>
    %79 = arith.maximumf %78, %77 : vector<8x4xf32>
    %80 = vector.broadcast %cst_46 : f32 to vector<8x4xf32>
    %81 = arith.minimumf %80, %79 : vector<8x4xf32>
    %82 = math.exp %81 : vector<8x4xf32>
    %c24_47 = arith.constant 24 : index
    %c0_48 = arith.constant 0 : index
    %83 = vector.load %arg0[%c24_47, %c0_48] : memref<40x128xf32, #tpu.memory_space<vmem>>, vector<8x4xf32>
    %84 = arith.mulf %82, %83 : vector<8x4xf32>
    %85 = arith.addf %76, %84 : vector<8x4xf32>
    %86 = math.tanh %85 : vector<8x4xf32>
    %cst_49 = arith.constant -5.000000e-01 : f32
    %87 = vector.broadcast %cst_49 : f32 to vector<8x4xf32>
    %88 = arith.mulf %87, %83 : vector<8x4xf32>
    %89 = arith.mulf %88, %83 : vector<8x4xf32>
    %90 = arith.subf %89, %81 : vector<8x4xf32>
    %cst_50 = arith.constant 0.918938517 : f32
    %91 = vector.broadcast %cst_50 : f32 to vector<8x4xf32>
    %92 = arith.subf %90, %91 : vector<8x4xf32>
    %93 = arith.mulf %86, %86 : vector<8x4xf32>
    %cst_51 = arith.constant 1.000000e+00 : f32
    %94 = vector.broadcast %cst_51 : f32 to vector<8x4xf32>
    %95 = arith.subf %94, %93 : vector<8x4xf32>
    %cst_52 = arith.constant 9.99999997E-7 : f32
    %96 = vector.broadcast %cst_52 : f32 to vector<8x4xf32>
    %97 = arith.addf %95, %96 : vector<8x4xf32>
    %98 = math.log %97 : vector<8x4xf32>
    %99 = arith.subf %92, %98 : vector<8x4xf32>
    %cst_53 = arith.constant dense<0.000000e+00> : vector<8xf32>
    %100 = vector.multi_reduction <add>, %99, %cst_53 [1] : vector<8x4xf32> to vector<8xf32>
    %101 = vector.shape_cast %100 : vector<8xf32> to vector<8x1xf32>
    %cst_54 = arith.constant 0.000000e+00 : f32
    %102 = vector.broadcast %cst_54 : f32 to vector<8x107xf32>
    %103 = tpu.concatenate %86, %76, %81, %101, %52, %102 in 1 : vector<8x4xf32>, vector<8x4xf32>, vector<8x4xf32>, vector<8x1xf32>, vector<8x8xf32>, vector<8x107xf32> -> vector<8x128xf32>
    %cst_55 = arith.constant 0.000000e+00 : f32
    %104 = vector.broadcast %cst_55 : f32 to vector<2x104xf32>
    %105 = tpu.concatenate %50, %46, %45, %104 in 1 : vector<2x8xf32>, vector<2x8xf32>, vector<2x8xf32>, vector<2x104xf32> -> vector<2x128xf32>
    %cst_56 = arith.constant 0.000000e+00 : f32
    %106 = vector.broadcast %cst_56 : f32 to vector<6x128xf32>
    %107 = tpu.concatenate %103, %105, %106 in 0 : vector<8x128xf32>, vector<2x128xf32>, vector<6x128xf32> -> vector<16x128xf32>
    %c0_57 = arith.constant 0 : index
    %c0_58 = arith.constant 0 : index
    %108 = vector.load %arg2[%c0_57, %c0_58] : memref<16x128xf32, #tpu.memory_space<vmem>>, vector<16x128xf32>
    tpu.vector_store %arg2[%c0_57, %c0_58], %107 {strides = array<i32>} : memref<16x128xf32, #tpu.memory_space<vmem>>, vector<16x128xf32>,
    return
  }
}

</mosaic_0001>

<bundles_post_ra>
// kernel: agent_forward.1
= control target key start
LH: loop header
LB: loop body
LE: loop exit
PB: predicated region body
PF: predicated region fallthrough
CT: control target
= control target key end

     0   :  { %vm25_vm0 = vcmask 1044480   ;;  %vm18_vm1 = vcmask 171008   ;;  %s642_s21 = smov 96   ;;  %s643_s22 = smov 32   ;;  %vm80_vm2 = vcmask 261120   ;;  %vm236_vm15 = vcmask 130048   ;;  %s811_s1 = inlined_call_operand.vmem [shape: f32[56,128], index: 1, kind: input, shape index: {}]   ;;  %s812_s0 = inlined_call_operand.vmem [shape: f32[40,128], index: 0, kind: input, shape index: {}]   ;;  %s813_s2 = inlined_call_operand.vmem [shape: f32[16,128], index: 2, kind: output, shape index: {}]  }
   0x1   :  { %v15_v0 = vld [vmem:[%s811_s1 + $0x10] sm:$0x1f]  ;;  %v14_v1 = vld [vmem:[%s811_s1 + $0x8] sm:$0xff]  ;;  %v57_v3 = vld [vmem:[%s811_s1 + $0x18] sm:$0xff]  ;;  %s644_s3 = smov 64   ;;  %s645_s4 = smov 120  }
   0x2   :  { %551 = vmatpush.msk.msra.mxu0 %vm25_vm0, %v15_v0  ;;  %v56_v2 = vld [vmem:[%s811_s1 + $0x10] sm:$0xff]  ;;  %v13_v4 = vld [vmem:[%s811_s1] sm:$0xff]  ;;  %v12_v8 = vld [vmem:[%s812_s0 + $0x8] sm:$0xff]  ;;  %s646_s17 = smov 16   ;;  %s649_s23 = smov 8  }
   0x3   :  { %v681_v5 = vpack.i.bf16 %v56_v2, %v57_v3  ;;  %v11_v6 = vld [vmem:[%s812_s0] sm:$0xff]  ;;  %v689_v7 = vpack.i.bf16 %v13_v4, %v14_v1  ;;  %v616_v16 = vld [vmem:[%s811_s1 + $0x18] ss:$0 sm:$0xff] }
   0x4   :  { %43 = vmatpush.msra.mxu0 %v14_v1  ;;  %v702_v9 = vld [vmem:[%s811_s1 + $0x20] ss:$0 sm:$0xff] }
   0x5   :  { %577 = vrot.lane.b32.xlu0 %v681_v5, %s642_s21  ;;  %592 = vrot.lane.b32.xlu2 %v689_v7, %s643_s22  ;;  %v224_v59 = vld [vmem:[%s811_s1 + $0x20] sm:$0x3] }
   0x6   :  { %44 = vmatpush.msra.mxu0 %v13_v4  ;;  %587 = vrot.lane.b32.xlu1 %v681_v5, %s643_s22 }
   0x7   :  { %552 = vmatmul.msk.f32.vlgmr.msra.gmra.mxu0 %vm18_vm1, %v11_v6 }
   0xd   :  { %582 = vrot.lane.b32.xlu0 %v689_v7, %s642_s21  ;;  %124 = vrot.lane.b32.xlu2 %v702_v9, %s643_s22  ;;  %s648_s22 = smov 124  }
   0xe   :  { %77 = vrot.lane.b32.xlu1 %v702_v9, %s642_s21 }
   0xf   :  { %553 = vmatmul.msk.f32.gmra.mxu0 %vm18_vm1, %v12_v8 }
  0x15   :  { %226 = vrot.lane.b32.xlu2 %v224_v59, %s644_s3  ;;  %v309_v59 = vld [vmem:[%s812_s0 + $0x20] sm:$0x3] }
  0x5f   :  { %v593_v26 = vpop.permute.xlu2 %592 }
  0x60   :  { %v594_v27 = vunpack.i.l.bf16 %v593_v26  ;;  %v595_v28 = vunpack.i.h.bf16 %v593_v26 }
  0x67   :  { %v125_v36 = vpop.permute.xlu2 %124 }
  0x77   :  { %v578_v10 = vpop.permute.xlu0 %577 }
  0x78   :  { %v579_v11 = vunpack.i.l.bf16 %v578_v10  ;;  %v580_v12 = vunpack.i.h.bf16 %v578_v10  ;;  %v588_v23 = vpop.permute.xlu1 %587 }
  0x79   :  { %v589_v24 = vunpack.i.l.bf16 %v588_v23  ;;  %v590_v25 = vunpack.i.h.bf16 %v588_v23 }
  0x7a   :  { %99 = vmatpush.msra.mxu1 %v579_v11 }
  0x7b   :  { %145 = vmatpush.msra.mxu2 %v589_v24 }
  0x7c   :  { %100 = vmatpush.msra.mxu1 %v580_v12 }
  0x7d   :  { %146 = vmatpush.msra.mxu2 %v590_v25 }
  0x7f   :  { %v583_v13 = vpop.permute.xlu0 %582  ;;  %147 = vmatpush.msra.mxu2 %v594_v27 }
  0x80   :  { %v584_v14 = vunpack.i.l.bf16 %v583_v13  ;;  %v585_v15 = vunpack.i.h.bf16 %v583_v13  ;;  %v78_v29 = vpop.permute.xlu1 %77 }
  0x81   :  { %148 = vmatpush.msra.mxu2 %v595_v28 }
  0x82   :  { %101 = vmatpush.msra.mxu1 %v584_v14 }
  0x84   :  { %v46_v17 = vpop.f32.mrf.mxu0  ;;  %102 = vmatpush.msra.mxu1 %v585_v15 }
  0x85   :  { %v47_v18 = vadd.f32 %v616_v16, %v46_v17 }
  0x87   :  { %v52_v19 = vmax.f32 %v47_v18, 0.0 }
  0x89   :  { %554 = vmatmul.msk.f32.vlgmr.msra.gmra.mxu1 %vm80_vm2, %v52_v19 }
  0x8c   :  { %v49_v20 = vpop.f32.mrf.mxu0 }
  0x8d   :  { %v50_v21 = vadd.f32 %v616_v16, %v49_v20 }
  0x8f   :  { %v53_v22 = vmax.f32 %v50_v21, 0.0 }
  0x91   :  { %555 = vmatmul.msk.f32.gmra.mxu1 %vm80_vm2, %v53_v22 }
 0x106   :  { %v104_v30 = vpop.f32.mrf.mxu1 }
 0x107   :  { %v105_v31 = vadd.f32 %v104_v30, %v78_v29 }
 0x109   :  { %v110_v32 = vmax.f32 %v105_v31, 0.0 }
 0x10b   :  { %556 = vmatmul.msk.f32.vlgmr.msra.gmra.mxu2 %vm80_vm2, %v110_v32 }
 0x10e   :  { %v107_v33 = vpop.f32.mrf.mxu1 }
 0x10f   :  { %v108_v34 = vadd.f32 %v107_v33, %v78_v29  ;;  %v312_v33 = vld [vmem:[%s811_s1 + $0x28] sm:$0xff] }
 0x110   :  { %387 = vmatpush.msrb.mxu1 %v312_v33 }
 0x111   :  { %v111_v35 = vmax.f32 %v108_v34, 0.0 }
 0x113   :  { %557 = vmatmul.msk.f32.gmra.mxu2 %vm80_vm2, %v111_v35  ;;  %v227_v35 = vpop.permute.xlu2 %226 }
 0x18e   :  { %v150_v37 = vpop.f32.mrf.mxu2 }
 0x18f   :  { %v714_v38 = vadd.f32 %v150_v37, %v125_v36 }
 0x191   :  { %v162_v39 = vand.u32 2147483647, %v714_v38  ;;  %v156_v58 = vmax.f32 %v714_v38, 0.0  ;;  %vm158_vm4 = vcmp.ne.f32.partialorder %v714_v38, %v714_v38 }
 0x193   :  { %v164_v40 = vsub.f32 0.0, %v162_v39 }
 0x195   :  { %v166_v41 = vmul.f32 1.442695, %v164_v40 }
 0x196   :  { %v153_v42 = vpop.f32.mrf.mxu2 }
 0x197   :  { %620 = vpow2.f32 %v166_v41  ;;  %v717_v43 = vadd.f32 %v153_v42, %v125_v36 }
 0x199   :  { %v163_v44 = vand.u32 2147483647, %v717_v43  ;;  %v157_v6 = vmax.f32 %v717_v43, 0.0  ;;  %vm159_vm6 = vcmp.ne.f32.partialorder %v717_v43, %v717_v43 }
 0x19b   :  { %v165_v45 = vsub.f32 0.0, %v163_v44 }
 0x19d   :  { %v621_v46 = vpop.eup %620  ;;  %v168_v47 = vmul.f32 1.442695, %v165_v45 }
 0x19e   :  { %v170_v48 = vadd.f32 1.0, %v621_v46  ;;  %v173_v49 = vmul.f32 -0.5, %v621_v46  ;;  %v176_v51 = vand.u32 2147483647, %v621_v46 }
 0x19f   :  { %622 = vpow2.f32 %v168_v47 }
 0x1a0   :  { %624 = vlog2.f32 %v170_v48  ;;  %v174_v50 = vadd.f32 1.0, %v173_v49  ;;  %vm177_vm3 = vcmp.lt.f32.partialorder %v176_v51, 0.0004427343 }
 0x1a2   :  { %v175_v56 = vmul.f32 %v621_v46, %v174_v50 }
 0x1a5   :  { %v623_v52 = vpop.eup %622 }
 0x1a6   :  { %v625_v53 = vpop.eup %624  ;;  %v179_v54 = vadd.f32 1.0, %v623_v52  ;;  %v182_v57 = vmul.f32 -0.5, %v623_v52  ;;  %v185_v0 = vand.u32 2147483647, %v623_v52 }
 0x1a7   :  { %v172_v55 = vmul.f32 0.6931472, %v625_v53 }
 0x1a8   :  { %626 = vlog2.f32 %v179_v54  ;;  %v183_v62 = vadd.f32 1.0, %v182_v57  ;;  %vm186_vm5 = vcmp.lt.f32.partialorder %v185_v0, 0.0004427343 }
 0x1a9   :  { %v178_v60 = vsel %vm177_vm3, %v175_v56, %v172_v55 }
 0x1aa   :  { %v188_v61 = vadd.f32 %v178_v60, %v156_v58  ;;  %v184_v4 = vmul.f32 %v623_v52, %v183_v62 }
 0x1ac   :  { %v190_v63 = vsel %vm158_vm4, %v714_v38, %v188_v61 }
 0x1ad   :  { %v192_v1 = vmax.f32 %v190_v63, 1e-07 }
 0x1ae   :  { %v627_v2 = vpop.eup %626 }
 0x1af   :  { %628 = vrcp.f32 %v192_v1  ;;  %v181_v3 = vmul.f32 0.6931472, %v627_v2  ;;  %v205_v16 = vand.u32 2147483648, %v192_v1  ;;  %v203_v18 = vand.u32 2147483647, %v192_v1 }
 0x1b0   :  { %vm199_vm8 = vweird.f32 %v192_v1 }
 0x1b1   :  { %v187_v8 = vsel %vm186_vm5, %v184_v4, %v181_v3  ;;  %v206_v21 = vor.u32 1.1754944e-38, %v205_v16  ;;  %vm204_vm10 = vcmp.eq.f32.partialorder %v203_v18, 8.507059e+37  ;;  %v344_v3 = vld [vmem:[%s811_s1 + $0x20] sm:$0xff]  ;;  %v343_v4 = vld [vmem:[%s812_s0 + $0x10] sm:$0xff] }
 0x1b2   :  { %v189_v10 = vadd.f32 %v187_v8, %v157_v6  ;;  %388 = vmatpush.msrb.mxu1 %v344_v3  ;;  %v618_v6 = vld [vmem:[%s811_s1 + $0x28] ss:$0 sm:$0xff]  ;;  %v619_v16 = vld [vmem:[%s811_s1 + $0x30] ss:$0 sm:$0xff] }
 0x1b3   :  { %563 = vmatmul.msk.f32.vlgmr.msrb.gmra.mxu1 %vm236_vm15, %v343_v4  ;;  %396 = vrot.lane.b32.xlu2 %v618_v6, %s642_s21 }
 0x1b4   :  { %v191_v11 = vsel %vm159_vm6, %v717_v43, %v189_v10 }
 0x1b5   :  { %v629_v12 = vpop.eup %628  ;;  %v193_v13 = vmax.f32 %v191_v11, 1e-07 }
 0x1b6   :  { %v195_v14 = vmul.f32 %v629_v12, %v192_v1  ;;  %vm200_vm7 = vweird.f32 %v629_v12 }
 0x1b7   :  { %630 = vrcp.f32 %v193_v13  ;;  %vm201_vm9 = vmor %vm199_vm8, %vm200_vm7  ;;  %v220_v26 = vand.u32 2147483648, %v193_v13  ;;  %v218_v28 = vand.u32 2147483647, %v193_v13  ;;  %vm214_vm12 = vweird.f32 %v193_v13 }
 0x1b8   :  { %v196_v15 = vsub.f32 1.0, %v195_v14  ;;  %vm319_vm8 = vcmask 1041408  }
 0x1b9   :  { %v221_v30 = vor.u32 1.1754944e-38, %v220_v26  ;;  %vm219_vm14 = vcmp.eq.f32.partialorder %v218_v28, 8.507059e+37 }
 0x1ba   :  { %v197_v17 = vmul.f32 %v629_v12, %v196_v15 }
 0x1bb   :  { %416 = vrot.lane.b32.xlu2 %v619_v16, %s642_s21  ;;  %s647_s21 = smov 4  }
 0x1bc   :  { %v198_v19 = vadd.f32 %v629_v12, %v197_v17 }
 0x1bd   :  { %v631_v20 = vpop.eup %630 }
 0x1be   :  { %v202_v22 = vsel %vm201_vm9, %v629_v12, %v198_v19  ;;  %v210_v23 = vmul.f32 %v631_v20, %v193_v13  ;;  %vm215_vm11 = vweird.f32 %v631_v20  ;;  %vm316_vm9 = vcmask 15360  }
 0x1bf   :  { %v207_v24 = vsel %vm204_vm10, %v206_v21, %v202_v22  ;;  %vm216_vm13 = vmor %vm214_vm12, %vm215_vm11  ;;  %vm346_vm10 = vcmask 64512   ;;  %vm511_vm11 = vcmask 31744   ;;  %vm527_vm12 = vcmask 97280  }
 0x1c0   :  { %230 = vrot.lane.b32.xlu1 %v207_v24, %s645_s4  ;;  %v211_v25 = vsub.f32 1.0, %v210_v23 }
 0x1c2   :  { %v212_v27 = vmul.f32 %v631_v20, %v211_v25 }
 0x1c4   :  { %v213_v29 = vadd.f32 %v631_v20, %v212_v27 }
 0x1c6   :  { %v217_v31 = vsel %vm216_vm13, %v631_v20, %v213_v29  ;;  %vm529_vm13 = vcmask 105472  }
 0x1c7   :  { %v222_v32 = vsel %vm219_vm14, %v221_v30, %v217_v31 }
 0x1c8   :  { %232 = vrot.lane.b32.xlu0 %v222_v32, %s645_s4  ;;  %597 = vrot.lane.b32.xlu1 %v681_v5, %s644_s3 }
 0x1d0   :  { %314 = vrot.lane.b32.xlu0 %v312_v33, %s644_s3  ;;  %607 = vrot.lane.b32.xlu1 %v681_v5, %s646_s17 }
 0x1d8   :  { %602 = vrot.lane.b32.xlu0 %v689_v7, %s644_s3  ;;  %455 = vrot.lane.b32.xlu1 %v702_v9, %s646_s17  ;;  %v485_v9 = vld [vmem:[%s812_s0 + $0x18] sm:$0xff]  ;;  %s650_s0 = smov 13  }
 0x1d9   :  { %487 = vrot.lane.b32.xlu2 %v485_v9, %s647_s21 }
 0x1e0   :  { %612 = vrot.lane.b32.xlu0 %v689_v7, %s646_s17 }
 0x20d   :  { %v397_v18 = vpop.permute.xlu2 %396 }
 0x215   :  { %v417_v27 = vpop.permute.xlu2 %416 }
 0x230   :  { %v390_v7 = vpop.f32.mrf.mxu1 }
 0x232   :  { %v231_v37 = vpop.permute.xlu1 %230 }
 0x233   :  { %v259_v39 = vmul.f32 %v231_v37, %v714_v38 }
 0x23a   :  { %v233_v34 = vpop.permute.xlu0 %232  ;;  %v598_v10 = vpop.permute.xlu1 %597 }
 0x23b   :  { %253 = vmatpush.msra.mxu3 %v233_v34  ;;  %v260_v36 = vmul.f32 %v233_v34, %v717_v43  ;;  %v345_v43 = vld [vmem:[%s811_s1 + $0x30] sm:$0xff]  ;;  %v599_v11 = vunpack.i.l.bf16 %v598_v10  ;;  %v600_v12 = vunpack.i.h.bf16 %v598_v10 }
 0x23c   :  { %365 = vmatpush.msrb.mxu0 %v345_v43 }
 0x23d   :  { %254 = vmatpush.msra.mxu3 %v231_v37  ;;  %434 = vmatpush.msrb.mxu2 %v599_v11  ;;  %v488_v37 = vpop.permute.xlu2 %487 }
 0x23e   :  { %558 = vmatmul.msk.f32.vlgmr.msra.gmra.mxu3 %vm236_vm15, %v227_v35 }
 0x23f   :  { %275 = vmatpush.msrb.mxu3 %v260_v36  ;;  %435 = vmatpush.msrb.mxu2 %v600_v12 }
 0x241   :  { %276 = vmatpush.msrb.mxu3 %v259_v39 }
 0x242   :  { %v315_v2 = vpop.permute.xlu0 %314  ;;  %v608_v22 = vpop.permute.xlu1 %607 }
 0x243   :  { %v610_v24 = vunpack.i.h.bf16 %v608_v22  ;;  %v609_v25 = vunpack.i.l.bf16 %v608_v22 }
 0x246   :  { %559 = vmatmul.msk.f32.vlgmr.msrb.gmra.mxu3 %vm236_vm15, %v227_v35 }
 0x24a   :  { %v603_v13 = vpop.permute.xlu0 %602  ;;  %v456_v31 = vpop.permute.xlu1 %455 }
 0x24b   :  { %v604_v14 = vunpack.i.l.bf16 %v603_v13  ;;  %v605_v15 = vunpack.i.h.bf16 %v603_v13 }
 0x24d   :  { %436 = vmatpush.msrb.mxu2 %v604_v14 }
 0x24f   :  { %437 = vmatpush.msrb.mxu2 %v605_v15 }
 0x252   :  { %v613_v23 = vpop.permute.xlu0 %612 }
 0x253   :  { %v614_v26 = vunpack.i.l.bf16 %v613_v23  ;;  %v615_v5 = vunpack.i.h.bf16 %v613_v23 }
 0x2c1   :  { %v256_v40 = vpop.f32.mrf.mxu3 }
 0x2c2   :  { %632 = vrcp.f32 %v256_v40  ;;  %v292_v45 = vand.u32 2147483648, %v256_v40  ;;  %v290_v47 = vand.u32 2147483647, %v256_v40  ;;  %vm286_vm3 = vweird.f32 %v256_v40 }
 0x2c4   :  { %v293_v38 = vor.u32 1.1754944e-38, %v292_v45  ;;  %vm291_vm5 = vcmp.eq.f32.partialorder %v290_v47, 8.507059e+37 }
 0x2c8   :  { %v633_v41 = vpop.eup %632 }
 0x2c9   :  { %v282_v42 = vmul.f32 %v633_v41, %v256_v40  ;;  %vm287_vm0 = vweird.f32 %v633_v41  ;;  %v278_v61 = vpop.f32.mrf.mxu3 }
 0x2ca   :  { %vm288_vm4 = vmor %vm286_vm3, %vm287_vm0 }
 0x2cb   :  { %v283_v44 = vsub.f32 1.0, %v282_v42 }
 0x2cd   :  { %v284_v46 = vmul.f32 %v633_v41, %v283_v44 }
 0x2cf   :  { %v285_v48 = vadd.f32 %v633_v41, %v284_v46 }
 0x2d1   :  { %v289_v49 = vsel %vm288_vm4, %v633_v41, %v285_v48 }
 0x2d2   :  { %v745_v50 = vsel %vm291_vm5, %v293_v38, %v289_v49 }
 0x2d3   :  { %634 = vrsqrt.f32 %v745_v50  ;;  %vm304_vm6 = vcmp.eq.f32.partialorder %v745_v50, inf  ;;  %v307_v58 = vand.u32 2147483648, %v745_v50  ;;  %vm306_vm7 = vcmp.eq.f32.partialorder %v745_v50, 0.0 }
 0x2d4   :  { %v758_v63 = vmul.f32 %v745_v50, %v278_v61 }
 0x2d9   :  { %v635_v51 = vpop.eup %634 }
 0x2da   :  { %v298_v52 = vmul.f32 %v635_v51, %v745_v50 }
 0x2dc   :  { %v299_v53 = vmul.f32 %v635_v51, %v298_v52 }
 0x2de   :  { %v300_v54 = vmul.f32 0.5, %v299_v53 }
 0x2e0   :  { %v301_v55 = vsub.f32 1.5, %v300_v54  ;;  %v497_v54 = vmul.f32 -0.5, %v485_v9 }
 0x2e2   :  { %v302_v56 = vmul.f32 %v635_v51, %v301_v55 }
 0x2e4   :  { %v303_v57 = vmul.f32 %v302_v56, %v745_v50 }
 0x2e6   :  { %v305_v60 = vsel %vm304_vm6, %v745_v50, %v303_v57 }
 0x2e7   :  { %v308_v62 = vsel %vm306_vm7, %v307_v58, %v305_v60  ;;  %v498_v58 = vmul.f32 %v497_v54, %v485_v9 }
 0x2e8   :  { %v310_v0 = vmul.f32 %v309_v59, %v308_v62 }
 0x2ea   :  { %v761_v1 = vadd.f32 %v310_v0, %v758_v63 }
 0x2ec   :  { %560 = vmatpush.msk.msra.mxu3 %vm319_vm8, %v761_v1 }
 0x2ed   :  { %561 = vmatmul.msk.f32.vlgmr.msra.gmra.mxu3 %vm316_vm9, %v315_v2 }
 0x2ee   :  { %473 = vmatpush.msrb.mxu3 %v609_v25 }
 0x2f0   :  { %474 = vmatpush.msrb.mxu3 %v610_v24 }
 0x2f2   :  { %475 = vmatpush.msrb.mxu3 %v614_v26 }
 0x2f4   :  { %476 = vmatpush.msrb.mxu3 %v615_v5 }
 0x370   :  { %v340_v8 = vpop.f32.mrf.mxu3 }
 0x371   :  { %562 = vmatmul.msk.f32.vlgmr.msrb.gmra.mxu0 %vm346_vm10, %v340_v8 }
 0x3ee   :  { %v367_v17 = vpop.f32.mrf.mxu0 }
 0x3ef   :  { %v391_v19 = vadd.f32 %v390_v7, %v367_v17 }
 0x3f1   :  { %v399_v20 = vadd.f32 %v397_v18, %v391_v19 }
 0x3f3   :  { %v400_v21 = vmax.f32 %v399_v20, 0.0 }
 0x3f5   :  { %564 = vmatmul.msk.f32.vlgmr.msrb.gmra.mxu2 %vm80_vm2, %v400_v21 }
 0x478   :  { %v439_v28 = vpop.f32.mrf.mxu2 }
 0x479   :  { %v440_v29 = vadd.f32 %v439_v28, %v417_v27 }
 0x47b   :  { %v442_v30 = vmax.f32 %v440_v29, 0.0 }
 0x47d   :  { %565 = vmatmul.msk.f32.vlgmr.msrb.gmra.mxu3 %vm80_vm2, %v442_v30  ;;  %vm542_vm2 = vcmask 195584  }
 0x500   :  { %v478_v32 = vpop.f32.mrf.mxu3 }
 0x501   :  { %v479_v33 = vadd.f32 %v478_v32, %v456_v31 }
 0x503   :  { %516 = vrot.lane.b32.xlu2 %v479_v33, %s647_s21  ;;  %v481_v34 = vmax.f32 %v479_v33, -20.0 }
 0x505   :  { %v482_v35 = vmin.f32 %v481_v34, 2.0 }
 0x507   :  { %500 = vrot.lane.b32.xlu1 %v482_v35, %s648_s22  ;;  %v483_v36 = vmul.f32 1.442695, %v482_v35 }
 0x509   :  { %636 = vpow2.f32 %v483_v36 }
 0x50b   :  { %533 = vrot.lane.b32.xlu2 %v758_v63, %s649_s23 }
 0x50f   :  { %v637_v39 = vpop.eup %636  ;;  %519 = vrot.lane.b32.xlu1 %v482_v35, %s647_s21 }
 0x510   :  { %v490_v40 = vmul.f32 %v637_v39, %v488_v37 }
 0x512   :  { %492 = vrot.lane.b32.xlu0 %v490_v40, %s648_s22 }
 0x513   :  { %522 = vrot.lane.b32.xlu2 %v340_v8, %s650_s0 }
 0x517   :  { %537 = vrot.lane.b32.xlu1 %v745_v50, %s646_s17 }
 0x55d   :  { %v517_v42 = vpop.permute.xlu2 %516 }
 0x565   :  { %v534_v47 = vpop.permute.xlu2 %533 }
 0x566   :  { %v540_v43 = vsel %vm346_vm10, %v761_v1, %v534_v47 }
 0x56d   :  { %v523_v2 = vpop.permute.xlu2 %522 }
 0x579   :  { %v501_v41 = vpop.permute.xlu1 %500 }
 0x57a   :  { %v503_v59 = vsub.f32 %v498_v58, %v501_v41 }
 0x57c   :  { %v566_v61 = vadd.f32 -0.9189385, %v503_v59 }
 0x581   :  { %v520_v44 = vpop.permute.xlu1 %519 }
 0x584   :  { %v493_v45 = vpop.permute.xlu0 %492 }
 0x585   :  { %v495_v46 = vadd.f32 %v493_v45, %v479_v33 }
 0x587   :  { %638 = vtanh.f32 %v495_v46 }
 0x589   :  { %v538_v48 = vpop.permute.xlu1 %537 }
 0x58a   :  { %v541_v38 = vsel %vm236_vm15, %v540_v43, %v538_v48 }
 0x58b   :  { %v543_v49 = vsel %vm542_vm2, %v541_v38, 0.0 }
 0x58c   :  { %v544_v51 = vsel %vm319_vm8, %v543_v49, 0.0 }
 0x58d   :  { %v639_v52 = vpop.eup %638  ;;  %546 = vst [vmem:[%s813_s2 + $0x8] sm:$0xff] %v544_v51 }
 0x58e   :  { %v505_v50 = vmul.f32 %v639_v52, %v639_v52  ;;  %v525_v53 = vsel %vm511_vm11, %v639_v52, %v517_v42 }
 0x58f   :  { %v526_v55 = vsel %vm346_vm10, %v525_v53, %v520_v44 }
 0x590   :  { %v506_v56 = vsub.f32 1.0, %v505_v50 }
 0x592   :  { %v507_v57 = vadd.f32 1e-06, %v506_v56 }
 0x594   :  { %640 = vlog2.f32 %v507_v57 }
 0x59a   :  { %v641_v60 = vpop.eup %640 }
 0x59b   :  { %v509_v62 = vmul.f32 0.6931472, %v641_v60 }
 0x59d   :  { %v510_v63 = vsub.f32 %v566_v61, %v509_v62 }
 0x59f   :  { %v512_v0 = vsel %vm511_vm11, %v510_v63, 0.0 }
 0x5a0   :  { %513 = vadd.xlane.f32.xlu0 %v512_v0 }
 0x613   :  { %v514_v1 = vpop.xlane.xlu0 %513 }
 0x614   :  { %v528_v3 = vsel %vm527_vm12, %v526_v55, %v514_v1 }
 0x615   :  { %v530_v4 = vsel %vm529_vm13, %v528_v3, %v523_v2 }
 0x616   :  { %v531_v6 = vsel %vm18_vm1, %v530_v4, 0.0 }
 0x617   :  { %545 = vst [vmem:[%s813_s2] sm:$0xff] %v531_v6 }

</bundles_post_ra>
